<compile_context>
chip_gen: v5e
topology: v5e:2x2
jax: 0.10.0
libtpu: 0.0.40
codegen_flags: <defaults>
</compile_context>

<pallas_src>
import functools

import jax
import jax.numpy as jnp
from jax.experimental import pallas as pl
from jax.experimental.pallas import tpu as pltpu


def _ce_kernel(total_n, tile_n, tiles_per_split,
               logits_ref, labels_ref, out_ref, acc_ref):
    s = pl.program_id(0)          # parallel split (per-core on 2-TC chips)
    t = pl.program_id(1)          # sequential batch tiles inside the split

    @pl.when(t == 0)
    def _():
        acc_ref[...] = jnp.zeros_like(acc_ref)

    logits = logits_ref[...].astype(jnp.float32)      # (TN, C) f32 compute
    labels = labels_ref[...]                          # (TN, 1) int32

    # Row logsumexp: max + exp-sum are the only per-row XLU reductions.
    m = jnp.max(logits, axis=-1, keepdims=True)                        # (TN,1)
    sum_e = jnp.sum(jnp.exp(logits - m), axis=-1, keepdims=True)       # (TN,1)
    lse = jnp.log(sum_e) + m                                           # (TN,1)

    cls = jax.lax.broadcasted_iota(jnp.int32, logits.shape, 1)         # (TN,C)

    tile_idx = s * tiles_per_split + t
    tile_start = tile_idx * tile_n

    def _accum(row_labels, lse_rows):
        # Label-logit term as a lane-dense full-2D where-select reduce (no
        # bool->f32 cast, no multiply, no per-row cross-lane reduce).
        label_sum = jnp.sum(jnp.where(cls == row_labels, logits, 0.0),
                            keepdims=True)                             # (1,1)
        acc_ref[...] += jnp.sum(lse_rows, keepdims=True) - label_sum

    @pl.when(tile_start + tile_n <= total_n)
    def _():
        # Interior tile: every row is a real sample -> mask-free fast path.
        _accum(labels, lse)

    @pl.when(tile_start + tile_n > total_n)
    def _():
        # Tail / over-allocated tile: mask rows >= total_n.  Keep these as
        # selects (jnp.where) so NaN/Inf from padded HBM rows stays inert.
        row = tile_start + jax.lax.broadcasted_iota(jnp.int32, (tile_n, 1), 0)
        valid = row < total_n
        _accum(jnp.where(valid, labels, -1), jnp.where(valid, lse, 0.0))

    @pl.when(t == pl.num_programs(1) - 1)
    def _():
        total = jnp.sum(acc_ref[...])                 # (1,1) -> scalar
        out_ref[...] = jnp.full(out_ref.shape, total, jnp.float32)


def _vmem_capacity_bytes():
    cap = 64 << 20                                    # conservative (v7x TC)
    try:
        v = int(pltpu.get_tpu_info().vmem_capacity_bytes)
        if v > 0:
            cap = v
    except Exception:
        pass
    return min(max(cap, 64 << 20), 128 << 20)


def _num_tensorcores():
    try:
        info = pltpu.get_tpu_info()
        for attr in ("num_cores", "core_count", "num_tensorcores",
                     "tensorcores_per_chip"):
            v = getattr(info, attr, None)
            if v:
                return max(1, min(2, int(v)))
    except Exception:
        pass
    return 1                                          # v5e/v6e (1 TC) default


def cross_entropy_loss(logits, labels, *, tile_n=None, num_splits=None,
                       logits_vmem_budget=None, vmem_limit_bytes=None):
    """Mean cross-entropy over N samples. logits: (N, C), labels: (N,) int."""
    N, C = logits.shape
    itemsize = jnp.dtype(logits.dtype).itemsize
    row_mult = 8 * max(1, 4 // itemsize)              # 8 f32 / 16 bf16 / 32 i8

    cap = _vmem_capacity_bytes()
    if logits_vmem_budget is None:
        # ~24 MiB of double-buffered logits on 64 MiB chips, ~48 MiB on 128.
        logits_vmem_budget = max(16 << 20, min((3 * cap) // 8, 48 << 20))
    if vmem_limit_bytes is None:
        vmem_limit_bytes = min(max(48 << 20, 2 * logits_vmem_budget),
                               (7 * cap) // 8, 112 << 20)

    if num_splits is None:
        num_splits = _num_tensorcores()

    n_pad = ((N + row_mult - 1) // row_mult) * row_mult
    if tile_n is None:
        rows = logits_vmem_budget // (2 * C * itemsize)   # double-buffered
        tile_n = min(rows, 16384)
    tile_n = max(row_mult, min(int(tile_n), n_pad))
    tile_n = max(row_mult, (tile_n // row_mult) * row_mult)

    num_tiles = pl.cdiv(N, tile_n)
    num_splits = max(1, min(int(num_splits), num_tiles))
    tiles_per_split = pl.cdiv(num_tiles, num_splits)

    labels2d = labels.astype(jnp.int32).reshape(N, 1)

    def in_map(s, t):
        # Clamp so over-allocated split slots re-read the last real tile;
        # their rows are masked in-kernel so they contribute zero.
        return (jnp.minimum(s * tiles_per_split + t, num_tiles - 1), 0)

    partial_sums = pl.pallas_call(
        functools.partial(_ce_kernel, N, tile_n, tiles_per_split),
        out_shape=jax.ShapeDtypeStruct((num_splits, 8, 128), jnp.float32),
        grid_spec=pltpu.PrefetchScalarGridSpec(
            num_scalar_prefetch=0,
            grid=(num_splits, tiles_per_split),
            in_specs=[
                pl.BlockSpec((tile_n, C), in_map),      # logits tile
                pl.BlockSpec((tile_n, 1), in_map),      # labels tile
            ],
            # Lane-dense per-split partial-sum block (written once per split).
            out_specs=pl.BlockSpec((1, 8, 128), lambda s, t: (s, 0, 0)),
            scratch_shapes=[pltpu.VMEM((1, 1), jnp.float32)],
        ),
        compiler_params=pltpu.CompilerParams(
            dimension_semantics=("parallel", "arbitrary"),
            vmem_limit_bytes=int(vmem_limit_bytes),
        ),
    )(logits, labels2d)

    return jnp.sum(partial_sums[:, 0, 0]) / jnp.float32(N)


if __name__ == "__main__":
    key = jax.random.PRNGKey(0)
    k1, k2, k3, k4, k5, k6 = jax.random.split(key, 6)

    def ref_ce(lg, lb):
        logp = jax.nn.log_softmax(lg.astype(jnp.float32), axis=-1)
        return -jnp.mean(jnp.take_along_axis(logp, lb[:, None], axis=-1)[:, 0])

    # Small classifier-head shape: N samples x C classes.
    N, C = 16, 128
    logits = jax.random.normal(k1, (N, C), dtype=jnp.float32)
    labels = jax.random.randint(k2, (N,), 0, C, dtype=jnp.int32)
    loss = cross_entropy_loss(logits, labels)
    jax.block_until_ready(loss)
    assert jnp.allclose(loss, ref_ce(logits, labels), atol=1e-5, rtol=1e-5), (
        loss, ref_ce(logits, labels))

    # Ragged batch (N not a multiple of the tile) + explicit 2-way core split.
    N2, C2 = 100, 128
    logits2 = jax.random.normal(k3, (N2, C2), dtype=jnp.float32)
    labels2 = jax.random.randint(k4, (N2,), 0, C2, dtype=jnp.int32)
    loss2 = cross_entropy_loss(logits2, labels2, tile_n=32, num_splits=2)
    jax.block_until_ready(loss2)
    assert jnp.allclose(loss2, ref_ce(logits2, labels2), atol=1e-5, rtol=1e-5), (
        loss2, ref_ce(logits2, labels2))

    # bf16 logits stay bf16 through the DMA; upcast happens in-kernel.
    N3, C3 = 64, 256
    logits3 = jax.random.normal(k5, (N3, C3), dtype=jnp.bfloat16)
    labels3 = jax.random.randint(k6, (N3,), 0, C3, dtype=jnp.int32)
    loss3 = cross_entropy_loss(logits3, labels3)
    jax.block_until_ready(loss3)
    assert jnp.allclose(loss3, ref_ce(logits3, labels3), atol=1e-3, rtol=1e-3), (
        loss3, ref_ce(logits3, labels3))

    print("KERNEL_OK")
</pallas_src>

<mosaic_0001>
module attributes {stable_mosaic.version = 11 : i64} {
  func.func @_ce_kernel(%arg0: i32, %arg1: i32, %arg2: memref<16x128xf32, #tpu.memory_space<vmem>>, %arg3: memref<16x1xi32, #tpu.memory_space<vmem>>, %arg4: memref<1x8x128xf32, #tpu.memory_space<vmem>>, %arg5: memref<1x1xf32, #tpu.memory_space<vmem>>) attributes {dimension_semantics = [#tpu.dimension_semantics<parallel>, #tpu.dimension_semantics<arbitrary>], iteration_bounds = array<i64: 1, 1>, scalar_prefetch = 0 : i64, scratch_operands = 1 : i64, tpu.core_type = #tpu.core_type<tc>, window_params = [{transform_indices = @transform_0, window_bounds = array<i64: 16, 128>}, {transform_indices = @transform_1, window_bounds = array<i64: 16, 1>}, {transform_indices = @transform_2, window_bounds = array<i64: 1, 8, 128>}]} {
    %c0_i32 = arith.constant 0 : i32
    %0 = arith.cmpi eq, %arg1, %c0_i32 : i32
    %1 = arith.extui %0 : i1 to i32
    %c0_i32_0 = arith.constant 0 : i32
    %2 = arith.cmpi ne, %1, %c0_i32_0 : i32
    scf.if %2 {
      %cst_13 = arith.constant 0.000000e+00 : f32
      %29 = vector.broadcast %cst_13 : f32 to vector<1x1xf32>
      %c0_14 = arith.constant 0 : index
      %c0_15 = arith.constant 0 : index
      %30 = vector.load %arg5[%c0_14, %c0_15] : memref<1x1xf32, #tpu.memory_space<vmem>>, vector<1x1xf32>
      tpu.vector_store %arg5[%c0_14, %c0_15], %29 {strides = array<i32>} : memref<1x1xf32, #tpu.memory_space<vmem>>, vector<1x1xf32>,
    } else {
    }
    %c0 = arith.constant 0 : index
    %c0_1 = arith.constant 0 : index
    %3 = vector.load %arg2[%c0, %c0_1] : memref<16x128xf32, #tpu.memory_space<vmem>>, vector<16x128xf32>
    %c0_2 = arith.constant 0 : index
    %c0_3 = arith.constant 0 : index
    %4 = vector.load %arg3[%c0_2, %c0_3] : memref<16x1xi32, #tpu.memory_space<vmem>>, vector<16x1xi32>
    %cst = arith.constant dense<0xFF800000> : vector<16xf32>
    %5 = vector.multi_reduction <maximumf>, %3, %cst [1] : vector<16x128xf32> to vector<16xf32>
    %6 = vector.shape_cast %5 : vector<16xf32> to vector<16x1xf32>
    %7 = vector.broadcast %6 : vector<16x1xf32> to vector<16x128xf32>
    %8 = arith.subf %3, %7 : vector<16x128xf32>
    %9 = math.exp %8 : vector<16x128xf32>
    %cst_4 = arith.constant dense<0.000000e+00> : vector<16xf32>
    %10 = vector.multi_reduction <add>, %9, %cst_4 [1] : vector<16x128xf32> to vector<16xf32>
    %11 = vector.shape_cast %10 : vector<16xf32> to vector<16x1xf32>
    %12 = math.log %11 : vector<16x1xf32>
    %13 = arith.addf %12, %6 : vector<16x1xf32>
    %14 = tpu.iota {dimensions = array<i32: 1>} : vector<16x128xi32>
    %c1_i32 = arith.constant 1 : i32
    %15 = arith.muli %arg0, %c1_i32 : i32
    %16 = arith.addi %15, %arg1 : i32
    %c16_i32 = arith.constant 16 : i32
    %17 = arith.muli %16, %c16_i32 : i32
    %c16_i32_5 = arith.constant 16 : i32
    %18 = arith.addi %17, %c16_i32_5 : i32
    %c16_i32_6 = arith.constant 16 : i32
    %19 = arith.cmpi sle, %18, %c16_i32_6 : i32
    %20 = arith.extui %19 : i1 to i32
    %c0_i32_7 = arith.constant 0 : i32
    %21 = arith.cmpi ne, %20, %c0_i32_7 : i32
    scf.if %21 {
      %29 = vector.broadcast %4 : vector<16x1xi32> to vector<16x128xi32>
      %30 = arith.cmpi eq, %14, %29 : vector<16x128xi32>
      %cst_13 = arith.constant 0.000000e+00 : f32
      %31 = vector.broadcast %cst_13 : f32 to vector<16x128xf32>
      %32 = arith.select %30, %3, %31 : vector<16x128xi1>, vector<16x128xf32>
      %33 = vector.shape_cast %32 : vector<16x128xf32> to vector<1x16x128xf32>
      %cst_14 = arith.constant dense<0.000000e+00> : vector<1xf32>
      %34 = vector.multi_reduction <add>, %33, %cst_14 [1, 2] : vector<1x16x128xf32> to vector<1xf32>
      %35 = vector.shape_cast %34 : vector<1xf32> to vector<1x1x1xf32>
      %36 = vector.extract %35[0, 0, 0] : f32 from vector<1x1x1xf32>
      %37 = vector.broadcast %36 : f32 to vector<1x1xf32>
      %c0_15 = arith.constant 0 : index
      %c0_16 = arith.constant 0 : index
      %38 = vector.load %arg5[%c0_15, %c0_16] : memref<1x1xf32, #tpu.memory_space<vmem>>, vector<1x1xf32>
      %39 = vector.shape_cast %13 : vector<16x1xf32> to vector<1x16x1xf32>
      %cst_17 = arith.constant dense<0.000000e+00> : vector<1xf32>
      %40 = vector.multi_reduction <add>, %39, %cst_17 [1, 2] : vector<1x16x1xf32> to vector<1xf32>
      %41 = vector.shape_cast %40 : vector<1xf32> to vector<1x1x1xf32>
      %42 = vector.extract %41[0, 0, 0] : f32 from vector<1x1x1xf32>
      %43 = vector.broadcast %42 : f32 to vector<1x1xf32>
      %44 = arith.subf %43, %37 : vector<1x1xf32>
      %45 = arith.addf %38, %44 : vector<1x1xf32>
      %c0_18 = arith.constant 0 : index
      %c0_19 = arith.constant 0 : index
      %46 = vector.load %arg5[%c0_18, %c0_19] : memref<1x1xf32, #tpu.memory_space<vmem>>, vector<1x1xf32>
      tpu.vector_store %arg5[%c0_18, %c0_19], %45 {strides = array<i32>} : memref<1x1xf32, #tpu.memory_space<vmem>>, vector<1x1xf32>,
    } else {
    }
    %c16_i32_8 = arith.constant 16 : i32
    %22 = arith.addi %17, %c16_i32_8 : i32
    %c16_i32_9 = arith.constant 16 : i32
    %23 = arith.cmpi sgt, %22, %c16_i32_9 : i32
    %24 = arith.extui %23 : i1 to i32
    %c0_i32_10 = arith.constant 0 : i32
    %25 = arith.cmpi ne, %24, %c0_i32_10 : i32
    scf.if %25 {
      %29 = tpu.iota {dimensions = array<i32: 0>} : vector<16x1xi32>
      %30 = vector.broadcast %17 : i32 to vector<16x1xi32>
      %31 = arith.addi %30, %29 : vector<16x1xi32>
      %c16_i32_13 = arith.constant 16 : i32
      %32 = vector.broadcast %c16_i32_13 : i32 to vector<16x1xi32>
      %33 = arith.cmpi slt, %31, %32 : vector<16x1xi32>
      %c-1_i32 = arith.constant -1 : i32
      %34 = vector.broadcast %c-1_i32 : i32 to vector<16x1xi32>
      %35 = arith.select %33, %4, %34 : vector<16x1xi1>, vector<16x1xi32>
      %cst_14 = arith.constant 0.000000e+00 : f32
      %36 = vector.broadcast %cst_14 : f32 to vector<16x1xf32>
      %37 = arith.select %33, %13, %36 : vector<16x1xi1>, vector<16x1xf32>
      %38 = vector.broadcast %35 : vector<16x1xi32> to vector<16x128xi32>
      %39 = arith.cmpi eq, %14, %38 : vector<16x128xi32>
      %cst_15 = arith.constant 0.000000e+00 : f32
      %40 = vector.broadcast %cst_15 : f32 to vector<16x128xf32>
      %41 = arith.select %39, %3, %40 : vector<16x128xi1>, vector<16x128xf32>
      %42 = vector.shape_cast %41 : vector<16x128xf32> to vector<1x16x128xf32>
      %cst_16 = arith.constant dense<0.000000e+00> : vector<1xf32>
      %43 = vector.multi_reduction <add>, %42, %cst_16 [1, 2] : vector<1x16x128xf32> to vector<1xf32>
      %44 = vector.shape_cast %43 : vector<1xf32> to vector<1x1x1xf32>
      %45 = vector.extract %44[0, 0, 0] : f32 from vector<1x1x1xf32>
      %46 = vector.broadcast %45 : f32 to vector<1x1xf32>
      %c0_17 = arith.constant 0 : index
      %c0_18 = arith.constant 0 : index
      %47 = vector.load %arg5[%c0_17, %c0_18] : memref<1x1xf32, #tpu.memory_space<vmem>>, vector<1x1xf32>
      %48 = vector.shape_cast %37 : vector<16x1xf32> to vector<1x16x1xf32>
      %cst_19 = arith.constant dense<0.000000e+00> : vector<1xf32>
      %49 = vector.multi_reduction <add>, %48, %cst_19 [1, 2] : vector<1x16x1xf32> to vector<1xf32>
      %50 = vector.shape_cast %49 : vector<1xf32> to vector<1x1x1xf32>
      %51 = vector.extract %50[0, 0, 0] : f32 from vector<1x1x1xf32>
      %52 = vector.broadcast %51 : f32 to vector<1x1xf32>
      %53 = arith.subf %52, %46 : vector<1x1xf32>
      %54 = arith.addf %47, %53 : vector<1x1xf32>
      %c0_20 = arith.constant 0 : index
      %c0_21 = arith.constant 0 : index
      %55 = vector.load %arg5[%c0_20, %c0_21] : memref<1x1xf32, #tpu.memory_space<vmem>>, vector<1x1xf32>
      tpu.vector_store %arg5[%c0_20, %c0_21], %54 {strides = array<i32>} : memref<1x1xf32, #tpu.memory_space<vmem>>, vector<1x1xf32>,
    } else {
    }
    %c0_i32_11 = arith.constant 0 : i32
    %26 = arith.cmpi eq, %arg1, %c0_i32_11 : i32
    %27 = arith.extui %26 : i1 to i32
    %c0_i32_12 = arith.constant 0 : i32
    %28 = arith.cmpi ne, %27, %c0_i32_12 : i32
    scf.if %28 {
      %c0_13 = arith.constant 0 : index
      %c0_14 = arith.constant 0 : index
      %29 = vector.load %arg5[%c0_13, %c0_14] : memref<1x1xf32, #tpu.memory_space<vmem>>, vector<1x1xf32>
      %30 = vector.shape_cast %29 : vector<1x1xf32> to vector<1x1x1xf32>
      %cst_15 = arith.constant dense<0.000000e+00> : vector<1xf32>
      %31 = vector.multi_reduction <add>, %30, %cst_15 [1, 2] : vector<1x1x1xf32> to vector<1xf32>
      %32 = vector.shape_cast %31 : vector<1xf32> to vector<1x1x1xf32>
      %33 = vector.extract %32[0, 0, 0] : f32 from vector<1x1x1xf32>
      %34 = vector.broadcast %33 : f32 to vector<1x8x128xf32>
      %c0_16 = arith.constant 0 : index
      %c0_17 = arith.constant 0 : index
      %c0_18 = arith.constant 0 : index
      %35 = vector.load %arg4[%c0_16, %c0_17, %c0_18] : memref<1x8x128xf32, #tpu.memory_space<vmem>>, vector<1x8x128xf32>
      tpu.vector_store %arg4[%c0_16, %c0_17, %c0_18], %34 {strides = array<i32>} : memref<1x8x128xf32, #tpu.memory_space<vmem>>, vector<1x8x128xf32>,
    } else {
    }
    return
  }
  func.func @transform_0(%arg0: i32, %arg1: i32) -> (i32, i32) {
    %c1_i32 = arith.constant 1 : i32
    %0 = arith.muli %arg0, %c1_i32 : i32
    %1 = arith.addi %0, %arg1 : i32
    %c0_i32 = arith.constant 0 : i32
    %2 = arith.minsi %1, %c0_i32 : i32
    %c0_i32_0 = arith.constant 0 : i32
    %c0_i32_1 = arith.constant 0 : i32
    return %2, %c0_i32_0 : i32, i32
  }
  func.func @transform_1(%arg0: i32, %arg1: i32) -> (i32, i32) {
    %c1_i32 = arith.constant 1 : i32
    %0 = arith.muli %arg0, %c1_i32 : i32
    %1 = arith.addi %0, %arg1 : i32
    %c0_i32 = arith.constant 0 : i32
    %2 = arith.minsi %1, %c0_i32 : i32
    %c0_i32_0 = arith.constant 0 : i32
    %c0_i32_1 = arith.constant 0 : i32
    return %2, %c0_i32_0 : i32, i32
  }
  func.func @transform_2(%arg0: i32, %arg1: i32) -> (i32, i32, i32) {
    %c0_i32 = arith.constant 0 : i32
    %c0_i32_0 = arith.constant 0 : i32
    %c0_i32_1 = arith.constant 0 : i32
    return %arg0, %c0_i32, %c0_i32_0 : i32, i32, i32
  }
}

</mosaic_0001>

<bundles_post_ra>
// kernel: tpu_custom_call.1
= control target key start
LH: loop header
LB: loop body
LE: loop exit
PB: predicated region body
PF: predicated region fallthrough
CT: control target
= control target key end

     0   :  { %s327_s0 = inlined_call_operand.vmem [shape: f32[16,128], index: 0, kind: input, shape index: {}]   ;;  %s328_s1 = inlined_call_operand.vmem [shape: s32[16,1], index: 1, kind: input, shape index: {}]   ;;  %s329_s2 = inlined_call_operand.hbm [shape: f32[1,8,128], index: 2, kind: output, shape index: {}]  }
   0x1   :  { %v82_v0 = vld [vmem:[%s327_s0] sm:$0xff] }
   0x2   :  { %7 = vsyncpa [#allocation4], 0  ;;  %86 = vmax.xlane.f32.xlu0 %v82_v0  ;;  %v83_v1 = vld [vmem:[%s327_s0 + $0x8] sm:$0xff]  ;;  %v84_v2 = vld [vmem:[%s328_s1] sm:$0xff]  ;;  %v292_v3 = vmov 0   ;;  %v106_v13 = vlaneseq  ;;  %vm137_vm2 = vcmask 7168  }
   0x3   :  { %256 = vset.pattern.permute.xlu2 %v292_v3  ;;  %257 = vset.pattern.permute.xlu0 %v292_v3  ;;  %v85_v4 = vld [vmem:[%s328_s1 + $0x8] sm:$0xff]  ;;  %vm80_vm3 = vcmask 0   ;;  %v293_v38 = vmov 0.0   ;;  %s294_s17 = smov [#allocation3]   ;;  %s226_s21 = sshll.u32 %s329_s2, 4  ;;  %s227_s21 = int_to_ptr.hbm [resolvable:$true] %s226_s21 }
   0x4   :  { %116 = vperm.xlu2 %256, %v84_v2   ;;  %v107_v15 = vand.u32 127, %v106_v13  ;;  %81 = vst.msk [vmem:[#allocation2] sm:$0x1] %vm80_vm3, %v293_v38  ;;  %s224_s18 = sshll.u32 %s294_s17, 4  ;;  %s225_s18 = int_to_ptr.vmem [resolvable:$true] %s224_s18 }
   0xa   :  { %88 = vmax.xlane.f32.xlu0 %v83_v1 }
   0xb   :  { %v136_v47 = vld [vmem:[#allocation2] sm:$0x1] }
   0xc   :  { %119 = vperm.xlu2 %256, %v85_v4  }
  0x5e   :  { %v117_v14 = vpop.permute.xlu2 %116 }
  0x5f   :  { %vm121_vm0 = vcmp.eq.s32.totalorder %v107_v15, %v117_v14 }
  0x60   :  { %v123_v16 = vsel %vm121_vm0, %v82_v0, 0.0 }
  0x66   :  { %v120_v17 = vpop.permute.xlu2 %119 }
  0x67   :  { %vm122_vm1 = vcmp.eq.s32.totalorder %v107_v15, %v120_v17 }
  0x68   :  { %v124_v18 = vsel %vm122_vm1, %v83_v1, 0.0 }
  0x69   :  { %v125_v19 = vadd.f32 %v124_v18, %v123_v16 }
  0x6b   :  { %126 = vadd.xlane.f32.xlu0 %v125_v19 }
  0x75   :  { %v87_v5 = vpop.xlane.xlu0 %86 }
  0x76   :  { %v90_v6 = vsub.f32 %v82_v0, %v87_v5 }
  0x78   :  { %v92_v7 = vmul.f32 1.442695, %v90_v6 }
  0x7a   :  { %258 = vpow2.f32 %v92_v7 }
  0x7d   :  { %v89_v8 = vpop.xlane.xlu0 %88 }
  0x7e   :  { %v91_v9 = vsub.f32 %v83_v1, %v89_v8 }
  0x80   :  { %v259_v10 = vpop.eup %258  ;;  %v94_v11 = vmul.f32 1.442695, %v91_v9 }
  0x81   :  { %96 = vadd.xlane.f32.xlu1 %v259_v10 }
  0x82   :  { %260 = vpow2.f32 %v94_v11 }
  0x88   :  { %v261_v12 = vpop.eup %260 }
  0x89   :  { %98 = vadd.xlane.f32.xlu1 %v261_v12 }
  0xde   :  { %v127_v31 = vpop.xlane.xlu0 %126 }
  0xdf   :  { %v128_v32 = vrot.slane %v127_v31, 4 }
  0xe1   :  { %v129_v33 = vadd.f32 %v128_v32, %v127_v31 }
  0xe3   :  { %v130_v34 = vrot.slane %v129_v33, 2 }
  0xe5   :  { %v131_v35 = vadd.f32 %v130_v34, %v129_v33 }
  0xe7   :  { %v132_v36 = vrot.slane %v131_v35, 1 }
  0xe9   :  { %v133_v37 = vadd.f32 %v132_v36, %v131_v35 }
  0xeb   :  { %247 = vpush %v133_v37 }
  0xf4   :  { %v97_v20 = vpop.xlane.xlu1 %96 }
  0xf5   :  { %262 = vlog2.f32 %v97_v20 }
  0xfb   :  { %v263_v22 = vpop.eup %262 }
  0xfc   :  { %v99_v21 = vpop.xlane.xlu1 %98  ;;  %v101_v23 = vmul.f32 0.6931472, %v263_v22 }
  0xfd   :  { %264 = vlog2.f32 %v99_v21 }
  0xfe   :  { %v104_v25 = vadd.f32 %v101_v23, %v87_v5 }
 0x100   :  { %v138_v28 = vsel %vm137_vm2, %v104_v25, 0.0 }
 0x103   :  { %v265_v24 = vpop.eup %264 }
 0x104   :  { %v103_v26 = vmul.f32 0.6931472, %v265_v24 }
 0x106   :  { %v105_v27 = vadd.f32 %v103_v26, %v89_v8 }
 0x108   :  { %v139_v29 = vsel %vm137_vm2, %v105_v27, 0.0 }
 0x109   :  { %v140_v30 = vadd.f32 %v139_v29, %v138_v28 }
 0x10b   :  { %141 = vadd.xlane.f32.xlu1 %v140_v30 }
 0x11c   :  { %s248_s0 = spop %247 }
 0x11d   :  { %v135_v46 = vstv %s248_s0 }
 0x17e   :  { %v142_v39 = vpop.xlane.xlu1 %141 }
 0x17f   :  { %v143_v40 = vrot.slane %v142_v39, 4 }
 0x181   :  { %v144_v41 = vadd.f32 %v143_v40, %v142_v39 }
 0x183   :  { %v145_v42 = vrot.slane %v144_v41, 2 }
 0x185   :  { %v146_v43 = vadd.f32 %v145_v42, %v144_v41 }
 0x187   :  { %v147_v44 = vrot.slane %v146_v43, 1 }
 0x189   :  { %v148_v45 = vadd.f32 %v147_v44, %v146_v43 }
 0x18b   :  { %249 = vpush %v148_v45 }
 0x1bc   :  { %s250_s1 = spop %249 }
 0x1bd   :  { %v150_v48 = vstv %s250_s1 }
 0x1be   :  { %v151_v49 = vsub.f32 %v150_v48, %v135_v46 }
 0x1c0   :  { %v152_v50 = vadd.f32 %v151_v49, %v136_v47 }
 0x1c2   :  { %154 = vst.msk [vmem:[#allocation2] sm:$0x1] %vm80_vm3, %v152_v50 }
 0x1c9   :  { %v214_v51 = vld [vmem:[#allocation2] sm:$0x1] }
 0x1ca   :  { %251 = vpush %v214_v51 }
 0x1fb   :  { %s252_s22 = spop %251 }
 0x1fc   :  { %v217_v52 = vstv %s252_s22 }
 0x1fd   :  { %218 = vst [vmem:[#allocation3] sm:$0xff] %v217_v52 }
 0x1fe   :  { %229 = dma.vmem_to_hbm [thread:$0]  %s225_s18, 128, %s227_s21, [#allocation4]  }
 0x1ff   :  { %290 = dma.done.wait [#allocation4], 128  }
 0x200   :  { %291 = vsyncadd [#allocation4], 4294967168 }
 0x201   :  { %234 = vsyncpa [#allocation4], 1 }

</bundles_post_ra>
